<compile_context>
chip_gen: v5e
topology: v5e:2x2
jax: 0.10.0
libtpu: 0.0.40
codegen_flags: <defaults>
</compile_context>

<pallas_src>
import jax
import jax.numpy as jnp
from jax.experimental import pallas as pl
from jax.experimental.pallas import tpu as pltpu


def mlp_kernel(x_ref, w1_ref, b1_ref, w2_ref, b2_ref, o_ref):
    # Layer 1 on the MXU, f32 accumulation; bias + ReLU in f32 on the VPU.
    h = jnp.dot(x_ref[...], w1_ref[...], preferred_element_type=jnp.float32)
    h = jnp.maximum(h + b1_ref[...], 0.0)
    # Cast activations down to the weight dtype (no-op for f32) for layer 2.
    y = jnp.dot(h.astype(w2_ref.dtype), w2_ref[...],
                preferred_element_type=jnp.float32)
    o_ref[...] = (y + b2_ref[...]).astype(o_ref.dtype)


def _round_up(n, m):
    return (n + m - 1) // m * m


def _pad_to(a, shape):
    pads = [(0, s - d) for d, s in zip(a.shape, shape)]
    if all(p == (0, 0) for p in pads):
        return a
    return jnp.pad(a, pads)


def network_forward(x, w1, b1, w2, b2, *, tm=128, compute_dtype=None):
    """x: (B, in), w1: (in, h), b1: (1, h), w2: (h, out), b2: (1, out).

    compute_dtype: optional dtype (e.g. jnp.bfloat16) for the MXU operands
    x / W1 / W2. Accumulation, bias add and ReLU remain float32.
    """
    B, in_f = x.shape
    hidden = w1.shape[1]
    out_f = w2.shape[1]
    out_dtype = x.dtype

    # Lane-dense padding: hidden and output feature dims -> multiples of 128.
    hidden_p = _round_up(hidden, 128)
    out_p = _round_up(out_f, 128)

    # Batch tiling: tm rows per grid step (multiple of 8), pad B up to it.
    tm = min(tm, _round_up(B, 8))
    b_p = _round_up(B, tm)

    xp = _pad_to(x, (b_p, in_f))
    w1p = _pad_to(w1, (in_f, hidden_p))
    b1p = _pad_to(b1, (1, hidden_p)).astype(jnp.float32)
    w2p = _pad_to(w2, (hidden_p, out_p))
    b2p = _pad_to(b2, (1, out_p)).astype(jnp.float32)

    if compute_dtype is not None:
        xp = xp.astype(compute_dtype)
        w1p = w1p.astype(compute_dtype)
        w2p = w2p.astype(compute_dtype)

    grid = (b_p // tm,)
    flops = 2 * b_p * (in_f * hidden_p + hidden_p * out_p)
    bytes_accessed = (
        xp.size * xp.dtype.itemsize
        + w1p.size * w1p.dtype.itemsize
        + b1p.size * b1p.dtype.itemsize
        + w2p.size * w2p.dtype.itemsize
        + b2p.size * b2p.dtype.itemsize
        + b_p * out_p * jnp.dtype(out_dtype).itemsize
    )

    y = pl.pallas_call(
        mlp_kernel,
        out_shape=jax.ShapeDtypeStruct((b_p, out_p), out_dtype),
        grid=grid,
        in_specs=[
            # x: tiled along batch; auto double-buffered by the pipeline.
            pl.BlockSpec((tm, in_f), lambda i: (i, 0)),
            # Weights / biases: same block every step -> resident in VMEM.
            pl.BlockSpec((in_f, hidden_p), lambda i: (0, 0)),
            pl.BlockSpec((1, hidden_p), lambda i: (0, 0)),
            pl.BlockSpec((hidden_p, out_p), lambda i: (0, 0)),
            pl.BlockSpec((1, out_p), lambda i: (0, 0)),
        ],
        out_specs=pl.BlockSpec((tm, out_p), lambda i: (i, 0)),
        compiler_params=pltpu.CompilerParams(
            dimension_semantics=("parallel",)),
        cost_estimate=pl.CostEstimate(
            flops=flops, transcendentals=0, bytes_accessed=bytes_accessed),
    )(xp, w1p, b1p, w2p, b2p)

    return y[:B, :out_f]


def init_linear(key, in_features, out_features, dtype=jnp.float32):
    """PyTorch nn.Linear default init: U(-1/sqrt(fan_in), 1/sqrt(fan_in)).

    Weight is returned pre-transposed to (in_features, out_features); bias
    as (1, out_features) for in-kernel broadcasting.
    """
    kw, kb = jax.random.split(key)
    bound = 1.0 / jnp.sqrt(jnp.float32(in_features))
    w = jax.random.uniform(kw, (in_features, out_features), dtype,
                           minval=-bound, maxval=bound)
    b = jax.random.uniform(kb, (1, out_features), dtype,
                           minval=-bound, maxval=bound)
    return w, b


if __name__ == "__main__":
    # Small, forward-consistent sizes (hidden1_size == hidden2_size), but a
    # batch large enough to exercise the batch grid (grid = (2,) at tm=128).
    batch = 256
    input_size = 16
    hidden1_size = hidden2_size = 32
    output_size = 8

    key = jax.random.PRNGKey(0)
    kx, k1, k2 = jax.random.split(key, 3)

    x = jax.random.normal(kx, (batch, input_size), jnp.float32)
    w1, b1 = init_linear(k1, input_size, hidden1_size)    # layer1
    w2, b2 = init_linear(k2, hidden2_size, output_size)   # layer3

    # Pure-JAX reference of the forward semantics.
    ref = jnp.maximum(x @ w1 + b1, 0.0) @ w2 + b2

    # float32 path (exact up to accumulation order).
    y = network_forward(x, w1, b1, w2, b2, tm=128)
    y = jax.block_until_ready(y)
    assert y.shape == (batch, output_size)
    assert jnp.allclose(y, ref, atol=1e-5, rtol=1e-5)

    # bf16-operand path (f32 accumulate): the high-throughput MXU config on
    # v6e / v7x. Loose tolerance vs the f32 reference.
    y_bf16 = network_forward(x, w1, b1, w2, b2, tm=128,
                             compute_dtype=jnp.bfloat16)
    y_bf16 = jax.block_until_ready(y_bf16)
    assert y_bf16.shape == (batch, output_size)
    assert jnp.allclose(y_bf16, ref, atol=1e-1, rtol=1e-1)

    print("KERNEL_OK")
</pallas_src>

<mosaic_0001>
module attributes {stable_mosaic.version = 11 : i64} {
  func.func @mlp_kernel(%arg0: i32, %arg1: memref<128x16xf32, #tpu.memory_space<vmem>>, %arg2: memref<16x128xf32, #tpu.memory_space<vmem>>, %arg3: memref<1x128xf32, #tpu.memory_space<vmem>>, %arg4: memref<128x128xf32, #tpu.memory_space<vmem>>, %arg5: memref<1x128xf32, #tpu.memory_space<vmem>>, %arg6: memref<128x128xf32, #tpu.memory_space<vmem>>) attributes {dimension_semantics = [#tpu.dimension_semantics<parallel>], iteration_bounds = array<i64: 2>, scalar_prefetch = 0 : i64, scratch_operands = 0 : i64, tpu.core_type = #tpu.core_type<tc>, window_params = [{transform_indices = @transform_0, window_bounds = array<i64: 128, 16>}, {pipeline_mode = #tpu.pipeline_mode<synchronous>, transform_indices = @transform_1, window_bounds = array<i64: 16, 128>}, {pipeline_mode = #tpu.pipeline_mode<synchronous>, transform_indices = @transform_2, window_bounds = array<i64: 1, 128>}, {pipeline_mode = #tpu.pipeline_mode<synchronous>, transform_indices = @transform_3, window_bounds = array<i64: 128, 128>}, {pipeline_mode = #tpu.pipeline_mode<synchronous>, transform_indices = @transform_4, window_bounds = array<i64: 1, 128>}, {transform_indices = @transform_5, window_bounds = array<i64: 128, 128>}]} {
    %c0 = arith.constant 0 : index
    %c0_0 = arith.constant 0 : index
    %0 = vector.load %arg1[%c0, %c0_0] : memref<128x16xf32, #tpu.memory_space<vmem>>, vector<128x16xf32>
    %c0_1 = arith.constant 0 : index
    %c0_2 = arith.constant 0 : index
    %1 = vector.load %arg2[%c0_1, %c0_2] : memref<16x128xf32, #tpu.memory_space<vmem>>, vector<16x128xf32>
    %cst = arith.constant dense<0.000000e+00> : vector<128x128xf32>
    %2 = tpu.matmul %0, %1, %cst {dimension_numbers = #tpu.dot_dimension_numbers<[1], [0], [0], [1], [0, 0, 1, 1], [], []>} : vector<128x16xf32>, vector<16x128xf32>, vector<128x128xf32> -> vector<128x128xf32>
    %c0_3 = arith.constant 0 : index
    %c0_4 = arith.constant 0 : index
    %3 = vector.load %arg3[%c0_3, %c0_4] : memref<1x128xf32, #tpu.memory_space<vmem>>, vector<1x128xf32>
    %4 = vector.broadcast %3 : vector<1x128xf32> to vector<128x128xf32>
    %5 = arith.addf %2, %4 : vector<128x128xf32>
    %cst_5 = arith.constant 0.000000e+00 : f32
    %6 = vector.broadcast %cst_5 : f32 to vector<128x128xf32>
    %7 = arith.maximumf %5, %6 : vector<128x128xf32>
    %c0_6 = arith.constant 0 : index
    %c0_7 = arith.constant 0 : index
    %8 = vector.load %arg4[%c0_6, %c0_7] : memref<128x128xf32, #tpu.memory_space<vmem>>, vector<128x128xf32>
    %cst_8 = arith.constant dense<0.000000e+00> : vector<128x128xf32>
    %9 = tpu.matmul %7, %8, %cst_8 {dimension_numbers = #tpu.dot_dimension_numbers<[1], [0], [0], [1], [0, 0, 1, 1], [], []>} : vector<128x128xf32>, vector<128x128xf32>, vector<128x128xf32> -> vector<128x128xf32>
    %c0_9 = arith.constant 0 : index
    %c0_10 = arith.constant 0 : index
    %10 = vector.load %arg5[%c0_9, %c0_10] : memref<1x128xf32, #tpu.memory_space<vmem>>, vector<1x128xf32>
    %11 = vector.broadcast %10 : vector<1x128xf32> to vector<128x128xf32>
    %12 = arith.addf %9, %11 : vector<128x128xf32>
    %c0_11 = arith.constant 0 : index
    %c0_12 = arith.constant 0 : index
    %13 = vector.load %arg6[%c0_11, %c0_12] : memref<128x128xf32, #tpu.memory_space<vmem>>, vector<128x128xf32>
    tpu.vector_store %arg6[%c0_11, %c0_12], %12 {strides = array<i32>} : memref<128x128xf32, #tpu.memory_space<vmem>>, vector<128x128xf32>,
    return
  }
  func.func @transform_0(%arg0: i32) -> (i32, i32) {
    %c0_i32 = arith.constant 0 : i32
    %c0_i32_0 = arith.constant 0 : i32
    return %arg0, %c0_i32 : i32, i32
  }
  func.func @transform_1(%arg0: i32) -> (i32, i32) {
    %c0_i32 = arith.constant 0 : i32
    %c0_i32_0 = arith.constant 0 : i32
    %c0_i32_1 = arith.constant 0 : i32
    return %c0_i32, %c0_i32_0 : i32, i32
  }
  func.func @transform_2(%arg0: i32) -> (i32, i32) {
    %c0_i32 = arith.constant 0 : i32
    %c0_i32_0 = arith.constant 0 : i32
    %c0_i32_1 = arith.constant 0 : i32
    return %c0_i32, %c0_i32_0 : i32, i32
  }
  func.func @transform_3(%arg0: i32) -> (i32, i32) {
    %c0_i32 = arith.constant 0 : i32
    %c0_i32_0 = arith.constant 0 : i32
    %c0_i32_1 = arith.constant 0 : i32
    return %c0_i32, %c0_i32_0 : i32, i32
  }
  func.func @transform_4(%arg0: i32) -> (i32, i32) {
    %c0_i32 = arith.constant 0 : i32
    %c0_i32_0 = arith.constant 0 : i32
    %c0_i32_1 = arith.constant 0 : i32
    return %c0_i32, %c0_i32_0 : i32, i32
  }
  func.func @transform_5(%arg0: i32) -> (i32, i32) {
    %c0_i32 = arith.constant 0 : i32
    %c0_i32_0 = arith.constant 0 : i32
    return %arg0, %c0_i32 : i32, i32
  }
}

</mosaic_0001>

<bundles_post_ra>
// kernel: tpu_custom_call.1
= control target key start
LH: loop header
LB: loop body
LE: loop exit
PB: predicated region body
PF: predicated region fallthrough
CT: control target
= control target key end

     0   :  { %10 = vsyncpa [#allocation3], 0  ;;  %s960_s0 = inlined_call_operand.vmem [shape: f32[256,16], index: 0, kind: input, shape index: {}]   ;;  %s961_s1 = inlined_call_operand.vmem [shape: f32[16,128], index: 1, kind: input, shape index: {}]   ;;  %s962_s2 = inlined_call_operand.vmem [shape: f32[1,128], index: 2, kind: input, shape index: {}]   ;;  %s963_s3 = inlined_call_operand.vmem [shape: f32[128,128], index: 3, kind: input, shape index: {}]   ;;  %s964_s4 = inlined_call_operand.vmem [shape: f32[1,128], index: 4, kind: input, shape index: {}]   ;;  %s965_s5 = inlined_call_operand.hbm [shape: f32[256,128], index: 5, kind: output, shape index: {}]  }
   0x1   :  { %12 = vsyncpa [#allocation3 + $0x1], 0  ;;  %s759_s18 = smov 0   ;;  %s761_s19 = smov 0  }
   0x2   :  { %s763_s20 = smov 0   ;;  %s765_s21 = smov 0  }
   0x3 LB: > { %s780_s22 = sadd.s32 4294967295, %s725_s21   ;;  %s557_s23 = sadd.s32 4294967294, %s725_s21   ;;  %s725_s21 = sphi %s765_s21, %s971_s21   ;;  %s721_s20 = sphi %s763_s20, %s970_s20   ;;  %s717_s19 = sphi %s761_s19, %s969_s19   ;;  %s713_s18 = sphi %s759_s18, %s968_s18  }
   0x4   : > { %s784_s24 = sadd.s32 1, %s725_s21   ;;  %s135_s25 = sadd.s32 1, %s721_s20 }
   0x5   : > { %s132_s26 = ssub.s32 %s725_s21, %s784_s24  ;;  %p145_p0 = scmp.ne.s32.totalorder %s721_s20, %s717_s19 }
   0x6   : > { %p133_p1 = scmp.eq.s32.totalorder %s132_s26, 0  ;;  %p146_p2 = scmp.eq.s32.totalorder %s780_s22, 1 }
   0x7   : > { %p151_p3 = scmp.ne.s32.totalorder %s717_s19, %s713_s18  ;;  %p152_p4 = scmp.eq.s32.totalorder %s557_s23, 1 }
   0x8   : > { %s795_s27 = scalar_select %p133_p1, %s721_s20, %s135_s25  }
   0x9   : > { %p797_p5 = por %p146_p2, %p145_p0  ;;  %p801_p6 = por %p152_p4, %p151_p3 }
   0xa   : > { %p560_p7 = scmp.ge.s32.totalorder %s725_s21, 1  ;;  %p191_p8 = scmp.lt.s32.totalorder %s725_s21, 3 }
   0xc   : > { %p192_p9 = pnand %p560_p7, %p191_p8 }
   0xd   : > { %s562_s9 = sshll.u32 (!%p192_p9), %s780_s22, 4  ;;  %s216_s17 = sand.u32 (!%p192_p9), 1, %s717_s19  }
   0xe   : > { %195 = sbr.rel (%p192_p9) target bundleno = 395 (0x18b), region = 40  ;;  %p220_p10 = scmp.lt.s32.totalorder (!%p192_p9), %s562_s9, 31 }
   0xf   : > { %s561_s23 = sshll.u32 (!%p192_p9), %s216_s17, 7  ;;  %s585_s6 = sshll.u32 (!%p192_p9), %s780_s22, 7 }
  0x10   : > { %s908_s30 = scalar_lea.vmem (!%p192_p9), [#allocation2], %s561_s23  ;;  %s480_s12 = scalar_lea.sflag (!%p192_p9), [#allocation3], %s216_s17 }
  0x11   : > { %s683_s16 = scalar_lea.hbm (!%p192_p9), %s965_s5, 256 }
  0x13   : > { %v243_v0 = vld [vmem:[%s961_s1 + $0x8] sm:$0xff]  ;;  %v242_v1 = vld [vmem:[%s961_s1] sm:$0xff]  ;;  %s973_s9 = smov (!%p220_p10, %s562_s9), 31  ;;  %vm248_vm0 = vcmask 130048   ;;  %v393_v11 = vld [vmem:[%s963_s3 + $0x78] sm:$0xff] }
  0x14   : > { %311 = vmatpush.msra.mxu0 %v243_v0  ;;  %586 = vmatpush.msra.mxu3 %v243_v0  ;;  %s563_s10 = sshll.u32 %s973_s9, 3  ;;  %v392_v12 = vld [vmem:[%s963_s3 + $0x70] sm:$0xff]  ;;  %v391_v13 = vld [vmem:[%s963_s3 + $0x68] sm:$0xff]  ;;  %v390_v15 = vld [vmem:[%s963_s3 + $0x60] sm:$0xff]  ;;  %s491_s9 = scalar_lea.hbm %s965_s5, %s585_s6 }
  0x15   : > { %s817_s13 = scalar_lea.vmem %s960_s0, %s563_s10  ;;  %398 = vmatpush.msra.mxu1 %v393_v11  ;;  %588 = vmatpush.msra.mxu2 %v393_v11  ;;  %v389_v17 = vld [vmem:[%s963_s3 + $0x58] sm:$0xff]  ;;  %v388_v18 = vld [vmem:[%s963_s3 + $0x50] sm:$0xff]  ;;  %v387_v19 = vld [vmem:[%s963_s3 + $0x48] sm:$0xff]  ;;  %s492_s10 = sshll.u32 %s908_s30, 4  ;;  %s493_s10 = int_to_ptr.vmem [resolvable:$true] %s492_s10 }
  0x16   : > { %312 = vmatpush.msra.mxu0 %v242_v1  ;;  %587 = vmatpush.msra.mxu3 %v242_v1  ;;  %v226_v2 = vld [vmem:[%s817_s13] sm:$0xff]  ;;  %v227_v3 = vld [vmem:[%s817_s13 + $0x8] sm:$0xff]  ;;  %v228_v4 = vld [vmem:[%s817_s13 + $0x10] sm:$0xff]  ;;  %s494_s11 = sshll.u32 %s491_s9, 4  ;;  %s495_s11 = int_to_ptr.hbm [resolvable:$true] %s494_s11 }
  0x17   : > { %564 = vmatmul.msk.f32.vlgmr.msra.gmra.mxu0 %vm248_vm0, %v226_v2  ;;  %v229_v5 = vld [vmem:[%s817_s13 + $0x18] sm:$0xff]  ;;  %v236_v6 = vld [vmem:[%s817_s13 + $0x50] sm:$0xff]  ;;  %v230_v7 = vld [vmem:[%s817_s13 + $0x20] sm:$0xff]  ;;  %399 = vmatpush.msra.mxu1 %v392_v12  ;;  %s677_s14 = sshra.s32 %s495_s11, 4  ;;  %s678_s14 = int_to_ptr.hbm [resolvable:$true] %s677_s14 }
  0x18   : > { %574 = vmatmul.msk.f32.vlgmr.msra.gmra.mxu3 %vm248_vm0, %v236_v6  ;;  %v237_v8 = vld [vmem:[%s817_s13 + $0x58] sm:$0xff]  ;;  %v231_v9 = vld [vmem:[%s817_s13 + $0x28] sm:$0xff]  ;;  %v238_v10 = vld [vmem:[%s817_s13 + $0x60] sm:$0xff]  ;;  %590 = vmatpush.msra.mxu2 %v392_v12  ;;  %s679_s22 = scalar_lea.hbm %s678_s14, 128  ;;  %p684_p0 = scmp.lt.s32.totalorder %s678_s14, %s965_s5 }
  0x19   : > { %589 = vmatpush.msrb.mxu3 %v393_v11  ;;  %v232_v14 = vld [vmem:[%s817_s13 + $0x30] sm:$0xff]  ;;  %v239_v16 = vld [vmem:[%s817_s13 + $0x68] sm:$0xff]  ;;  %400 = vmatpush.msra.mxu1 %v391_v13  ;;  %v233_v20 = vld [vmem:[%s817_s13 + $0x38] sm:$0xff]  ;;  %p680_p11 = scmp.ne.s32.totalorder %s678_s14, %s679_s22  ;;  %p685_p1 = scmp.lt.s32.totalorder %s683_s16, %s679_s22 }
  0x1a   : > { %592 = vmatpush.msra.mxu2 %v391_v13  ;;  %v386_v21 = vld [vmem:[%s963_s3 + $0x40] sm:$0xff]  ;;  %v240_v22 = vld [vmem:[%s817_s13 + $0x70] sm:$0xff]  ;;  %v385_v23 = vld [vmem:[%s963_s3 + $0x38] sm:$0xff] }
  0x1b   : > { %591 = vmatpush.msrb.mxu3 %v392_v12  ;;  %401 = vmatpush.msra.mxu1 %v390_v15  ;;  %v384_v24 = vld [vmem:[%s963_s3 + $0x30] sm:$0xff]  ;;  %v383_v25 = vld [vmem:[%s963_s3 + $0x28] sm:$0xff]  ;;  %v234_v26 = vld [vmem:[%s817_s13 + $0x40] sm:$0xff]  ;;  %p681_p12 = pnand %p680_p11, %p797_p5  ;;  %p686_p2 = por %p685_p1, %p684_p0 }
  0x1c   : > { %594 = vmatpush.msra.mxu2 %v390_v15  ;;  %v382_v27 = vld [vmem:[%s963_s3 + $0x20] sm:$0xff]  ;;  %v241_v28 = vld [vmem:[%s817_s13 + $0x78] sm:$0xff]  ;;  %v235_v30 = vld [vmem:[%s817_s13 + $0x48] sm:$0xff] }
  0x1d   : > { %593 = vmatpush.msrb.mxu3 %v391_v13  ;;  %402 = vmatpush.msra.mxu1 %v389_v17  ;;  %v381_v29 = vld [vmem:[%s963_s3 + $0x18] sm:$0xff]  ;;  %v380_v31 = vld [vmem:[%s963_s3 + $0x10] sm:$0xff]  ;;  %v379_v32 = vld [vmem:[%s963_s3 + $0x8] sm:$0xff]  ;;  %p682_p13 = pneg %p681_p12 }
  0x1e   : > { %596 = vmatpush.msra.mxu2 %v389_v17  ;;  %v378_v33 = vld [vmem:[%s963_s3] sm:$0xff] }
  0x1f   : > { %565 = vmatmul.msk.f32.gmra.mxu0 %vm248_vm0, %v227_v3  ;;  %595 = vmatpush.msrb.mxu3 %v390_v15  ;;  %v661_v34 = vld [vmem:[%s962_s2] ss:$0 sm:$0xff]  ;;  %p687_p3 = pnand %p686_p2, %p682_p13 }
  0x20   : > { %575 = vmatmul.msk.f32.gmra.mxu3 %vm248_vm0, %v237_v8  ;;  %403 = vmatpush.msra.mxu1 %v388_v18 }
  0x21   : > { %597 = vmatpush.msrb.mxu3 %v389_v17  ;;  %598 = vmatpush.msra.mxu2 %v388_v18 }
  0x22   : > { %404 = vmatpush.msra.mxu1 %v387_v19 }
  0x23   : > { %599 = vmatpush.msrb.mxu3 %v388_v18  ;;  %600 = vmatpush.msra.mxu2 %v387_v19 }
  0x24   : > { %405 = vmatpush.msra.mxu1 %v386_v21 }
  0x25   : > { %602 = vmatpush.msra.mxu2 %v386_v21  ;;  %601 = vmatpush.msrb.mxu3 %v387_v19  ;;  %v662_v19 = vld [vmem:[%s964_s4] ss:$0 sm:$0xff] }
  0x26   : > { %406 = vmatpush.msra.mxu1 %v385_v23 }
  0x27   : > { %566 = vmatmul.msk.f32.gmra.mxu0 %vm248_vm0, %v228_v4  ;;  %604 = vmatpush.msra.mxu2 %v385_v23 }
  0x28   : > { %576 = vmatmul.msk.f32.gmra.mxu3 %vm248_vm0, %v238_v10  ;;  %407 = vmatpush.msra.mxu1 %v384_v24 }
  0x29   : > { %603 = vmatpush.msrb.mxu3 %v386_v21  ;;  %606 = vmatpush.msra.mxu2 %v384_v24 }
  0x2a   : > { %408 = vmatpush.msra.mxu1 %v383_v25 }
  0x2b   : > { %605 = vmatpush.msrb.mxu3 %v385_v23  ;;  %608 = vmatpush.msra.mxu2 %v383_v25 }
  0x2c   : > { %409 = vmatpush.msra.mxu1 %v382_v27 }
  0x2d   : > { %610 = vmatpush.msra.mxu2 %v382_v27  ;;  %607 = vmatpush.msrb.mxu3 %v384_v24 }
  0x2e   : > { %410 = vmatpush.msra.mxu1 %v381_v29 }
  0x2f   : > { %567 = vmatmul.msk.f32.gmra.mxu0 %vm248_vm0, %v229_v5  ;;  %612 = vmatpush.msra.mxu2 %v381_v29 }
  0x30   : > { %577 = vmatmul.msk.f32.gmra.mxu3 %vm248_vm0, %v239_v16  ;;  %411 = vmatpush.msra.mxu1 %v380_v31 }
  0x31   : > { %609 = vmatpush.msrb.mxu3 %v383_v25  ;;  %614 = vmatpush.msra.mxu2 %v380_v31 }
  0x32   : > { %412 = vmatpush.msra.mxu1 %v379_v32 }
  0x33   : > { %611 = vmatpush.msrb.mxu3 %v382_v27  ;;  %616 = vmatpush.msra.mxu2 %v379_v32 }
  0x34   : > { %413 = vmatpush.msra.mxu1 %v378_v33 }
  0x35   : > { %613 = vmatpush.msrb.mxu3 %v381_v29  ;;  %618 = vmatpush.msra.mxu2 %v378_v33 }
  0x37   : > { %568 = vmatmul.msk.f32.gmra.mxu0 %vm248_vm0, %v230_v7  ;;  %615 = vmatpush.msrb.mxu3 %v380_v31 }
  0x38   : > { %578 = vmatmul.msk.f32.gmra.mxu3 %vm248_vm0, %v240_v22 }
  0x39   : > { %617 = vmatpush.msrb.mxu3 %v379_v32 }
  0x3b   : > { %619 = vmatpush.msrb.mxu3 %v378_v33 }
  0x3f   : > { %569 = vmatmul.msk.f32.gmra.mxu0 %vm248_vm0, %v231_v9 }
  0x40   : > { %579 = vmatmul.msk.f32.gmra.mxu3 %vm248_vm0, %v241_v28 }
  0x47   : > { %570 = vmatmul.msk.f32.gmra.mxu0 %vm248_vm0, %v232_v14 }
  0x4f   : > { %571 = vmatmul.msk.f32.gmra.mxu0 %vm248_vm0, %v233_v20 }
  0x57   : > { %572 = vmatmul.msk.f32.gmra.mxu0 %vm248_vm0, %v234_v26 }
  0x5f   : > { %573 = vmatmul.msk.f32.gmra.mxu0 %vm248_vm0, %v235_v30 }
  0x94   : > { %v314_v35 = vpop.f32.mrf.mxu0 }
  0x95   : > { %v315_v36 = vadd.f32 %v661_v34, %v314_v35 }
  0x97   : > { %v362_v37 = vmax.f32 %v315_v36, 0.0 }
  0x99   : > { %414 = vmatmul.f32.vlgmr.msra.gmra.mxu1 %v362_v37 }
  0x9b   : > { %v344_v48 = vpop.f32.mrf.mxu3 }
  0x9c   : > { %v317_v38 = vpop.f32.mrf.mxu0  ;;  %v345_v11 = vadd.f32 %v661_v34, %v344_v48 }
  0x9d   : > { %v318_v39 = vadd.f32 %v661_v34, %v317_v38 }
  0x9e   : > { %v372_v12 = vmax.f32 %v345_v11, 0.0 }
  0x9f   : > { %v363_v40 = vmax.f32 %v318_v39, 0.0 }
  0xa1   : > { %417 = vmatmul.f32.gmra.mxu1 %v363_v40 }
  0xa3   : > { %v347_v52 = vpop.f32.mrf.mxu3 }
  0xa4   : > { %v320_v41 = vpop.f32.mrf.mxu0  ;;  %v348_v13 = vadd.f32 %v661_v34, %v347_v52 }
  0xa5   : > { %v321_v42 = vadd.f32 %v661_v34, %v320_v41 }
  0xa6   : > { %v373_v14 = vmax.f32 %v348_v13, 0.0 }
  0xa7   : > { %v364_v43 = vmax.f32 %v321_v42, 0.0 }
  0xa9   : > { %420 = vmatmul.f32.gmra.mxu1 %v364_v43 }
  0xab   : > { %v350_v56 = vpop.f32.mrf.mxu3 }
  0xac   : > { %v323_v44 = vpop.f32.mrf.mxu0  ;;  %v351_v15 = vadd.f32 %v661_v34, %v350_v56 }
  0xad   : > { %v324_v45 = vadd.f32 %v661_v34, %v323_v44 }
  0xae   : > { %v374_v16 = vmax.f32 %v351_v15, 0.0 }
  0xaf   : > { %v365_v46 = vmax.f32 %v324_v45, 0.0 }
  0xb1   : > { %423 = vmatmul.f32.gmra.mxu1 %v365_v46 }
  0xb3   : > { %v353_v60 = vpop.f32.mrf.mxu3 }
  0xb4   : > { %v326_v47 = vpop.f32.mrf.mxu0  ;;  %v354_v17 = vadd.f32 %v661_v34, %v353_v60 }
  0xb5   : > { %v327_v49 = vadd.f32 %v661_v34, %v326_v47 }
  0xb6   : > { %v375_v18 = vmax.f32 %v354_v17, 0.0 }
  0xb7   : > { %v366_v50 = vmax.f32 %v327_v49, 0.0 }
  0xb9   : > { %426 = vmatmul.f32.gmra.mxu1 %v366_v50 }
  0xbb   : > { %v356_v0 = vpop.f32.mrf.mxu3 }
  0xbc   : > { %v329_v51 = vpop.f32.mrf.mxu0  ;;  %v357_v2 = vadd.f32 %v661_v34, %v356_v0 }
  0xbd   : > { %v330_v53 = vadd.f32 %v661_v34, %v329_v51 }
  0xbe   : > { %v376_v4 = vmax.f32 %v357_v2, 0.0 }
  0xbf   : > { %v367_v54 = vmax.f32 %v330_v53, 0.0 }
  0xc0   : > { %456 = vmatmul.f32.vlgmr.msrb.gmra.mxu3 %v376_v4 }
  0xc1   : > { %429 = vmatmul.f32.gmra.mxu1 %v367_v54 }
  0xc3   : > { %v359_v6 = vpop.f32.mrf.mxu3 }
  0xc4   : > { %v332_v55 = vpop.f32.mrf.mxu0  ;;  %v360_v8 = vadd.f32 %v661_v34, %v359_v6 }
  0xc5   : > { %v333_v57 = vadd.f32 %v661_v34, %v332_v55 }
  0xc6   : > { %v377_v10 = vmax.f32 %v360_v8, 0.0 }
  0xc7   : > { %v368_v58 = vmax.f32 %v333_v57, 0.0 }
  0xc8   : > { %459 = vmatmul.f32.gmra.mxu3 %v377_v10 }
  0xc9   : > { %432 = vmatmul.f32.gmra.mxu1 %v368_v58 }
  0xcc   : > { %v335_v59 = vpop.f32.mrf.mxu0 }
  0xcd   : > { %v336_v61 = vadd.f32 %v661_v34, %v335_v59 }
  0xcf   : > { %v369_v62 = vmax.f32 %v336_v61, 0.0 }
  0xd1   : > { %435 = vmatmul.f32.vlgmr.msra.gmra.mxu2 %v369_v62 }
  0xd4   : > { %v338_v63 = vpop.f32.mrf.mxu0 }
  0xd5   : > { %v339_v1 = vadd.f32 %v661_v34, %v338_v63 }
  0xd7   : > { %v370_v3 = vmax.f32 %v339_v1, 0.0 }
  0xd9   : > { %438 = vmatmul.f32.gmra.mxu2 %v370_v3 }
  0xdc   : > { %v341_v5 = vpop.f32.mrf.mxu0 }
  0xdd   : > { %v342_v7 = vadd.f32 %v661_v34, %v341_v5 }
  0xdf   : > { %v371_v9 = vmax.f32 %v342_v7, 0.0 }
  0xe1   : > { %441 = vmatmul.f32.gmra.mxu2 %v371_v9 }
  0xe9   : > { %444 = vmatmul.f32.gmra.mxu2 %v372_v12 }
  0xf1   : > { %447 = vmatmul.f32.gmra.mxu2 %v373_v14 }
  0xf9   : > { %450 = vmatmul.f32.gmra.mxu2 %v374_v16 }
 0x101   : > { %453 = vmatmul.f32.gmra.mxu2 %v375_v18 }
 0x116   : > { %v415_v20 = vpop.f32.mrf.mxu1 }
 0x117   : > { %v416_v21 = vadd.f32 %v662_v19, %v415_v20 }
 0x119   : > { %463 = vst [vmem:[%s908_s30] sm:$0xff] %v416_v21 }
 0x11e   : > { %v418_v22 = vpop.f32.mrf.mxu1 }
 0x11f   : > { %v419_v23 = vadd.f32 %v662_v19, %v418_v22 }
 0x121   : > { %464 = vst [vmem:[%s908_s30 + $0x8] sm:$0xff] %v419_v23 }
 0x126   : > { %v421_v24 = vpop.f32.mrf.mxu1 }
 0x127   : > { %v422_v25 = vadd.f32 %v662_v19, %v421_v24 }
 0x129   : > { %465 = vst [vmem:[%s908_s30 + $0x10] sm:$0xff] %v422_v25 }
 0x12e   : > { %v424_v26 = vpop.f32.mrf.mxu1 }
 0x12f   : > { %v425_v27 = vadd.f32 %v662_v19, %v424_v26 }
 0x131   : > { %466 = vst [vmem:[%s908_s30 + $0x18] sm:$0xff] %v425_v27 }
 0x136   : > { %v427_v28 = vpop.f32.mrf.mxu1 }
 0x137   : > { %v428_v29 = vadd.f32 %v662_v19, %v427_v28 }
 0x139   : > { %467 = vst [vmem:[%s908_s30 + $0x20] sm:$0xff] %v428_v29 }
 0x13e   : > { %v430_v30 = vpop.f32.mrf.mxu1 }
 0x13f   : > { %v431_v31 = vadd.f32 %v662_v19, %v430_v30 }
 0x141   : > { %468 = vst [vmem:[%s908_s30 + $0x28] sm:$0xff] %v431_v31 }
 0x143   : > { %v457_v37 = vpop.f32.mrf.mxu3 }
 0x144   : > { %v458_v39 = vadd.f32 %v662_v19, %v457_v37 }
 0x146   : > { %v433_v32 = vpop.f32.mrf.mxu1  ;;  %477 = vst [vmem:[%s908_s30 + $0x70] sm:$0xff] %v458_v39 }
 0x147   : > { %v434_v33 = vadd.f32 %v662_v19, %v433_v32 }
 0x149   : > { %469 = vst [vmem:[%s908_s30 + $0x30] sm:$0xff] %v434_v33 }
 0x14b   : > { %v460_v41 = vpop.f32.mrf.mxu3 }
 0x14c   : > { %v461_v43 = vadd.f32 %v662_v19, %v460_v41 }
 0x14e   : > { %478 = vst [vmem:[%s908_s30 + $0x78] sm:$0xff] %v461_v43 }
 0x154   : > { %v436_v34 = vpop.f32.mrf.mxu2 }
 0x155   : > { %v437_v35 = vadd.f32 %v662_v19, %v436_v34 }
 0x157   : > { %470 = vst [vmem:[%s908_s30 + $0x38] sm:$0xff] %v437_v35 }
 0x15c   : > { %v439_v36 = vpop.f32.mrf.mxu2 }
 0x15d   : > { %v440_v38 = vadd.f32 %v662_v19, %v439_v36 }
 0x15f   : > { %471 = vst [vmem:[%s908_s30 + $0x40] sm:$0xff] %v440_v38 }
 0x164   : > { %v442_v40 = vpop.f32.mrf.mxu2 }
 0x165   : > { %v443_v42 = vadd.f32 %v662_v19, %v442_v40 }
 0x167   : > { %472 = vst [vmem:[%s908_s30 + $0x48] sm:$0xff] %v443_v42 }
 0x16c   : > { %v445_v44 = vpop.f32.mrf.mxu2 }
 0x16d   : > { %v446_v45 = vadd.f32 %v662_v19, %v445_v44 }
 0x16f   : > { %473 = vst [vmem:[%s908_s30 + $0x50] sm:$0xff] %v446_v45 }
 0x174   : > { %v448_v46 = vpop.f32.mrf.mxu2 }
 0x175   : > { %v449_v47 = vadd.f32 %v662_v19, %v448_v46 }
 0x177   : > { %474 = vst [vmem:[%s908_s30 + $0x58] sm:$0xff] %v449_v47 }
 0x17c   : > { %v451_v48 = vpop.f32.mrf.mxu2 }
 0x17d   : > { %v452_v49 = vadd.f32 %v662_v19, %v451_v48 }
 0x17f   : > { %475 = vst [vmem:[%s908_s30 + $0x60] sm:$0xff] %v452_v49 }
 0x184   : > { %v454_v50 = vpop.f32.mrf.mxu2 }
 0x185   : > { %v455_v51 = vadd.f32 %v662_v19, %v454_v50 }
 0x187   : > { %476 = vst [vmem:[%s908_s30 + $0x68] sm:$0xff] %v455_v51 }
 0x188   : > { %690 = shalt.err (!%p687_p3)
}
 0x189   : > { %s727_s17 = smov 128   ;;  %s728_s26 = smov 8  }
 0x18a   : > { %620 = dma.vmem_to_hbm [thread:$0]  (%p797_p5), %s493_s10, 2048, %s495_s11, %s480_s12, %s727_s17, %s727_s17, %s728_s26  }
 0x18b PF: > { %p626_p4 = scmp.ge.s32.totalorder %s725_s21, 2  ;;  %s509_s30 = sand.u32 1, %s713_s18  }
 0x18c   : > { %s510_s6 = scalar_lea.sflag [#allocation3], %s509_s30 }
 0x18d   : > { %p623_p7 = pnand %p626_p4, %p801_p6 }
 0x18f   : > { %p624_p8 = pneg %p623_p7 }
 0x191   : > { %708 = dma.done.wait (%p624_p8), %s510_s6, 2048  }
 0x192   : > { %710 = vsyncadd (%p624_p8), %s510_s6, 4294965248  ;;  %p15_p9 = scmp.ge.s32.totalorder %s784_s24, 4   ;;  %s968_s18 = smov %s717_s19 }
 0x193   : > { %s969_s19 = smov %s721_s20  ;;  %s970_s20 = smov %s795_s27 }
 0x194   : > { %s971_s21 = smov %s784_s24  ;;  %17 = sbr.rel (!%p15_p9) target bundleno = 3 (0x3), region = 75 }
 0x199   :  { %516 = vsyncpa [#allocation3], 1 }
 0x19a   :  { %518 = vsyncpa [#allocation3 + $0x1], 1 }

</bundles_post_ra>
